<compile_context>
chip_gen: v7x
topology: tpu7x:2x2x1
jax: 0.10.0
libtpu: 0.0.40
codegen_flags: <defaults>
</compile_context>

<pallas_src>
import functools
import math

import jax
import jax.numpy as jnp
import numpy as np
from jax.experimental import pallas as pl
from jax.experimental.pallas import tpu as pltpu


# ----------------------------------------------------------------------------
# Generation-aware VMEM budgets
# ----------------------------------------------------------------------------
def _vmem_capacity_bytes() -> int:
    try:
        cap = int(pltpu.get_tpu_info().vmem_capacity_bytes)
        if cap > 0:
            return cap
    except Exception:
        pass
    return 64 * 1024 * 1024          # conservative fallback (v7x-sized)


_VMEM_CAP = _vmem_capacity_bytes()
_VMEM_LIMIT = min((_VMEM_CAP * 3) // 4, 100 * 1024 * 1024)   # scoped limit
_VMEM_BUDGET = (_VMEM_CAP * 3) // 8                          # per-step working set
_FUSE_BYTES_LIMIT = 16 * 1024 * 1024                         # fuse 3 imgs below this


# ----------------------------------------------------------------------------
# Host-side glue (pure numpy -> folded into constants at trace time)
# ----------------------------------------------------------------------------
def _bilinear_weight_matrix(out_size: int, in_size: int) -> np.ndarray:
    """(out_size, in_size) W s.t. y = W @ x resamples axis 0 bilinearly
    (half-pixel centers, align_corners=False, 2-tap, no antialias)."""
    scale = in_size / out_size
    src = (np.arange(out_size, dtype=np.float64) + 0.5) * scale - 0.5
    src = np.clip(src, 0.0, in_size - 1)
    lo = np.floor(src).astype(np.int64)
    hi = np.minimum(lo + 1, in_size - 1)
    frac = (src - lo).astype(np.float32)
    w = np.zeros((out_size, in_size), dtype=np.float32)
    rows = np.arange(out_size)
    w[rows, lo] += (1.0 - frac)
    w[rows, hi] += frac
    return w


def _resolve_size(size, in_h: int, in_w: int):
    """torchvision semantics: int -> smaller edge becomes `size`, long edge is
    (size * long) // short; (h, w) pair -> exact size."""
    if isinstance(size, (tuple, list)):
        if len(size) == 2:
            return int(size[0]), int(size[1])
        size = int(size[0])
    size = int(size)
    if in_w <= in_h:
        return (size * in_h) // in_w, size
    return size, (size * in_w) // in_h


def _pick_block(s, per_slice, fixed, budget, align):
    """Number of (n*c) slices processed per grid step."""
    avail = budget - fixed
    want = max(1, int(avail // per_slice)) if avail > per_slice else 1
    if s > 4:
        want = min(want, -(-s // 4))       # keep >=4 grid steps (pipeline / 2 TCs)
    want = int(min(want, s))
    if want >= s:
        return s                           # full-array blocks are always legal
    b = (want // align) * align            # (8, .) BlockSpec rule on 2D slabs
    if b <= 0:
        b = align
    if b >= s:
        return s
    # Prefer a legal b that divides s (no padded tail step) if the loss is small.
    for cand in range(b, 0, -align):
        if s % cand == 0:
            return cand if 4 * cand >= 3 * b else b
    return b


def _finalize(out_f32, o_dtype):
    if jnp.issubdtype(o_dtype, jnp.integer):
        info = jnp.iinfo(o_dtype)
        out_f32 = jnp.clip(jnp.round(out_f32), info.min, info.max)
    return out_f32.astype(o_dtype)


# ----------------------------------------------------------------------------
# Pallas kernel: per grid step, resample a block of `b` slices (from each of
# the n fused images).  One pass is a single folded 2D MXU matmul, the other
# is a loop of 2D matmuls against the resident 2D weight (no broadcast).
# ----------------------------------------------------------------------------
def _resize_kernel(*refs, n_images, in_h, out_h, compute_dtype, height_first):
    wh_ref, wwt_ref = refs[0], refs[1]
    x_refs = refs[2:2 + n_images]
    o_refs = refs[2 + n_images:2 + 2 * n_images]
    t_ref = refs[2 + 2 * n_images]

    wh = wh_ref[...]                       # (OH, H)  compute dtype, resident
    wwt = wwt_ref[...]                     # (W, OW)  compute dtype, resident
    b = x_refs[0].shape[0] // in_h         # static slices per step

    for x_ref, o_ref in zip(x_refs, o_refs):
        o_dtype = o_ref.dtype

        if height_first:
            # Pass 1 (height): per-slice (OH,H)@(H,W) against the shared 2D Wh.
            def pass1(i, carry):
                xi = x_ref[pl.ds(pl.multiple_of(i * in_h, in_h), in_h), :]
                if xi.dtype != compute_dtype:
                    xi = xi.astype(compute_dtype)
                ui = jnp.dot(wh, xi, preferred_element_type=jnp.float32)
                t_ref[pl.ds(pl.multiple_of(i * out_h, out_h), out_h), :] = (
                    ui.astype(compute_dtype))
                return carry

            jax.lax.fori_loop(0, b, pass1, 0)
            # Pass 2 (width): one 2D matmul with the batch folded into M=b*OH.
            out = jnp.dot(t_ref[...], wwt, preferred_element_type=jnp.float32)
            o_ref[...] = _finalize(out, o_dtype)
        else:
            # Pass 1 (width): one 2D matmul with the batch folded into M=b*H.
            x = x_ref[...]
            if x.dtype != compute_dtype:
                x = x.astype(compute_dtype)
            t = jnp.dot(x, wwt, preferred_element_type=jnp.float32)
            t_ref[...] = t.astype(compute_dtype)

            # Pass 2 (height): per-slice (OH,H)@(H,OW) against the shared 2D Wh.
            def pass2(i, carry):
                ti = t_ref[pl.ds(pl.multiple_of(i * in_h, in_h), in_h), :]
                out = jnp.dot(wh, ti, preferred_element_type=jnp.float32)
                o_ref[pl.ds(pl.multiple_of(i * out_h, out_h), out_h), :] = (
                    _finalize(out, o_dtype))
                return carry

            jax.lax.fori_loop(0, b, pass2, 0)


def _resize_multi(xs, s, in_h, in_w, out_h, out_w):
    """xs: list of (s*in_h, in_w) arrays (same dtype) -> list of (s*out_h, out_w)."""
    n = len(xs)
    dtype = jnp.dtype(xs[0].dtype)

    # bf16 MXU operands for bf16 / integer (uint8) images; full f32 otherwise.
    if dtype == jnp.bfloat16 or jnp.issubdtype(dtype, jnp.integer):
        compute_dtype = jnp.dtype(jnp.bfloat16)
    else:
        compute_dtype = jnp.dtype(jnp.float32)

    wh = jnp.asarray(_bilinear_weight_matrix(out_h, in_h), dtype=compute_dtype)
    wwt = jnp.asarray(_bilinear_weight_matrix(out_w, in_w).T, dtype=compute_dtype)

    # Static pass-order choice: minimize per-slice MACs.
    macs_wf = out_w * in_h * (in_w + out_h)     # width pass folded first
    macs_hf = out_h * in_w * (in_h + out_w)     # height pass first
    height_first = macs_hf <= macs_wf
    t_elems = (out_h * in_w) if height_first else (in_h * out_w)

    io = dtype.itemsize
    c = compute_dtype.itemsize
    fixed = 2 * (out_h * in_h + in_w * out_w) * c            # resident weights (x2 bufs)
    per_slice = (n * 2 * (in_h * in_w + out_h * out_w) * io  # double-buffered I/O
                 + (4 + c) * t_elems                         # f32 intermediate + scratch
                 + 4 * out_h * out_w)                        # f32 result before store cast
    if not height_first:
        per_slice += c * in_h * in_w                         # block-wide cast copy of x

    align = max(8 // math.gcd(in_h, 8), 8 // math.gcd(out_h, 8))
    b = _pick_block(s, per_slice, fixed, _VMEM_BUDGET, align)
    grid = pl.cdiv(s, b)

    kernel = functools.partial(_resize_kernel, n_images=n, in_h=in_h,
                               out_h=out_h, compute_dtype=compute_dtype,
                               height_first=height_first)

    in_specs = [pl.BlockSpec((out_h, in_h), lambda i: (0, 0)),     # Wh (resident)
                pl.BlockSpec((in_w, out_w), lambda i: (0, 0))]     # Ww^T (resident)
    in_specs += [pl.BlockSpec((b * in_h, in_w), lambda i: (i, 0))
                 for _ in range(n)]
    out_specs = [pl.BlockSpec((b * out_h, out_w), lambda i: (i, 0))
                 for _ in range(n)]
    out_shape = [jax.ShapeDtypeStruct((s * out_h, out_w), dtype) for _ in range(n)]
    scratch_shape = (b * out_h, in_w) if height_first else (b * in_h, out_w)

    outs = pl.pallas_call(
        kernel,
        out_shape=out_shape,
        grid_spec=pltpu.PrefetchScalarGridSpec(
            num_scalar_prefetch=0,
            grid=(grid,),
            in_specs=in_specs,
            out_specs=out_specs,
            scratch_shapes=[pltpu.VMEM(scratch_shape, compute_dtype)],
        ),
        compiler_params=pltpu.CompilerParams(
            dimension_semantics=("parallel",),
            vmem_limit_bytes=_VMEM_LIMIT,
        ),
    )(wh, wwt, *xs)
    return list(outs)


# ----------------------------------------------------------------------------
# Public wrappers
# ----------------------------------------------------------------------------
@functools.partial(jax.jit, static_argnames=("size",))
def resize_bilinear(img, *, size):
    """Bilinear resize of a (..., H, W) array (torchvision TF.resize semantics)."""
    *lead, in_h, in_w = img.shape
    out_h, out_w = _resolve_size(size, in_h, in_w)
    if (out_h, out_w) == (in_h, in_w):
        return img                                  # torchvision no-op shortcut
    s = math.prod(lead) if lead else 1
    out = _resize_multi([img.reshape(s * in_h, in_w)], s, in_h, in_w,
                        out_h, out_w)[0]
    return out.reshape(tuple(lead) + (out_h, out_w))


@functools.partial(jax.jit, static_argnames=("size",))
def _resize_three_fused(img1, img2, img3, *, size):
    *lead, in_h, in_w = img1.shape
    out_h, out_w = _resolve_size(size, in_h, in_w)
    if (out_h, out_w) == (in_h, in_w):
        return img1, img2, img3
    s = math.prod(lead) if lead else 1
    xs = [im.reshape(s * in_h, in_w) for im in (img1, img2, img3)]
    outs = _resize_multi(xs, s, in_h, in_w, out_h, out_w)
    oshape = tuple(lead) + (out_h, out_w)
    return tuple(o.reshape(oshape) for o in outs)


class ResizeThreeInstances:
    """JAX/Pallas port of the PyTorch ResizeThreeInstances module."""

    def __init__(self, size, interpolation="bilinear"):
        if not isinstance(size, (int, tuple, list)):
            raise TypeError(f"Size should be int or sequence. Got {type(size)}")
        if isinstance(size, (tuple, list)) and len(size) not in (1, 2):
            raise ValueError("If size is a sequence, it should have 1 or 2 values")
        self.size = int(size) if isinstance(size, int) \
            else tuple(int(v) for v in size)
        self.interpolation = interpolation   # TODO(synk): only bilinear is implemented

    def __call__(self, img1, img2, img3):
        same = (img1.shape == img2.shape == img3.shape
                and img1.dtype == img2.dtype == img3.dtype)
        small = (img1.size * jnp.dtype(img1.dtype).itemsize) <= _FUSE_BYTES_LIMIT
        if same and small:
            # One fused pallas_call: 3 inputs / 3 outputs share grid + weights
            # + scratch (no concatenate round trip through HBM).
            return _resize_three_fused(img1, img2, img3, size=self.size)
        return (resize_bilinear(img1, size=self.size),
                resize_bilinear(img2, size=self.size),
                resize_bilinear(img3, size=self.size))


if __name__ == "__main__":
    key = jax.random.PRNGKey(0)
    k1, k2, k3 = jax.random.split(key, 3)

    # Small shapes consistent with the module: three NCHW image batches.
    img1 = jax.random.uniform(k1, (2, 4, 16, 16), dtype=jnp.float32)
    img2 = jax.random.uniform(k2, (2, 4, 16, 16), dtype=jnp.float32)
    img3 = jax.random.uniform(k3, (2, 4, 16, 16), dtype=jnp.float32)

    module = ResizeThreeInstances(size=8)   # int size -> smaller edge -> 8x8 here
    o1, o2, o3 = module(img1, img2, img3)
    jax.block_until_ready((o1, o2, o3))

    assert o1.shape == (2, 4, 8, 8) and o2.shape == (2, 4, 8, 8) and o3.shape == (2, 4, 8, 8)
    assert o1.dtype == img1.dtype and o3.dtype == img3.dtype

    # Sanity check against a pure-numpy separable bilinear reference.
    wh_np = _bilinear_weight_matrix(8, 16)
    ww_np = _bilinear_weight_matrix(8, 16)
    for out, img in ((o1, img1), (o2, img2), (o3, img3)):
        ref = np.einsum("oh,nchw,pw->ncop", wh_np, np.asarray(img, np.float32), ww_np)
        np.testing.assert_allclose(np.asarray(out, np.float32), ref, rtol=0, atol=1e-2)

    print("KERNEL_OK")
</pallas_src>

<mosaic_0001>
module attributes {stable_mosaic.version = 11 : i64} {
  func.func @_resize_kernel(%arg0: i32, %arg1: memref<8x16xf32, #tpu.memory_space<vmem>>, %arg2: memref<16x8xf32, #tpu.memory_space<vmem>>, %arg3: memref<32x16xf32, #tpu.memory_space<vmem>>, %arg4: memref<32x16xf32, #tpu.memory_space<vmem>>, %arg5: memref<32x16xf32, #tpu.memory_space<vmem>>, %arg6: memref<16x8xf32, #tpu.memory_space<vmem>>, %arg7: memref<16x8xf32, #tpu.memory_space<vmem>>, %arg8: memref<16x8xf32, #tpu.memory_space<vmem>>, %arg9: memref<16x16xf32, #tpu.memory_space<vmem>>) attributes {dimension_semantics = [#tpu.dimension_semantics<parallel>], iteration_bounds = array<i64: 4>, scalar_prefetch = 0 : i64, scratch_operands = 1 : i64, tpu.core_type = #tpu.core_type<tc>, window_params = [{pipeline_mode = #tpu.pipeline_mode<synchronous>, transform_indices = @transform_0, window_bounds = array<i64: 8, 16>}, {pipeline_mode = #tpu.pipeline_mode<synchronous>, transform_indices = @transform_1, window_bounds = array<i64: 16, 8>}, {transform_indices = @transform_2, window_bounds = array<i64: 32, 16>}, {transform_indices = @transform_3, window_bounds = array<i64: 32, 16>}, {transform_indices = @transform_4, window_bounds = array<i64: 32, 16>}, {transform_indices = @transform_5, window_bounds = array<i64: 16, 8>}, {transform_indices = @transform_6, window_bounds = array<i64: 16, 8>}, {transform_indices = @transform_7, window_bounds = array<i64: 16, 8>}]} {
    %c0 = arith.constant 0 : index
    %c0_0 = arith.constant 0 : index
    %0 = vector.load %arg1[%c0, %c0_0] : memref<8x16xf32, #tpu.memory_space<vmem>>, vector<8x16xf32>
    %c0_1 = arith.constant 0 : index
    %c0_2 = arith.constant 0 : index
    %1 = vector.load %arg2[%c0_1, %c0_2] : memref<16x8xf32, #tpu.memory_space<vmem>>, vector<16x8xf32>
    %c0_i32 = arith.constant 0 : i32
    %c2_i32 = arith.constant 2 : i32
    %2 = arith.addi %c0_i32, %c2_i32 : i32
    %c1_i32 = arith.constant 1 : i32
    scf.for %arg10 = %c0_i32 to %2 step %c1_i32  : i32 {
      %c16_i32 = arith.constant 16 : i32
      %14 = arith.muli %arg10, %c16_i32 : i32
      %15 = tpu.assume_multiple %14, 16 : i32
      %16 = arith.index_cast %15 : i32 to index
      %c0_26 = arith.constant 0 : index
      %17 = vector.load %arg3[%16, %c0_26] : memref<32x16xf32, #tpu.memory_space<vmem>>, vector<16x16xf32>
      %cst_27 = arith.constant dense<0.000000e+00> : vector<8x16xf32>
      %18 = tpu.matmul %0, %17, %cst_27 {dimension_numbers = #tpu.dot_dimension_numbers<[1], [0], [0], [1], [0, 0, 1, 1], [], []>} : vector<8x16xf32>, vector<16x16xf32>, vector<8x16xf32> -> vector<8x16xf32>
      %c8_i32 = arith.constant 8 : i32
      %19 = arith.muli %arg10, %c8_i32 : i32
      %20 = tpu.assume_multiple %19, 8 : i32
      %21 = arith.index_cast %20 : i32 to index
      %c0_28 = arith.constant 0 : index
      %22 = vector.load %arg9[%21, %c0_28] : memref<16x16xf32, #tpu.memory_space<vmem>>, vector<8x16xf32>
      tpu.vector_store %arg9[%21, %c0_28], %18 {strides = array<i32>} : memref<16x16xf32, #tpu.memory_space<vmem>>, vector<8x16xf32>,
    }
    %c2_i32_3 = arith.constant 2 : i32
    %c0_4 = arith.constant 0 : index
    %c0_5 = arith.constant 0 : index
    %3 = vector.load %arg9[%c0_4, %c0_5] : memref<16x16xf32, #tpu.memory_space<vmem>>, vector<16x16xf32>
    %cst = arith.constant dense<0.000000e+00> : vector<16x8xf32>
    %4 = tpu.matmul %3, %1, %cst {dimension_numbers = #tpu.dot_dimension_numbers<[1], [0], [0], [1], [0, 0, 1, 1], [], []>} : vector<16x16xf32>, vector<16x8xf32>, vector<16x8xf32> -> vector<16x8xf32>
    %c0_6 = arith.constant 0 : index
    %c0_7 = arith.constant 0 : index
    %5 = vector.load %arg6[%c0_6, %c0_7] : memref<16x8xf32, #tpu.memory_space<vmem>>, vector<16x8xf32>
    tpu.vector_store %arg6[%c0_6, %c0_7], %4 {strides = array<i32>} : memref<16x8xf32, #tpu.memory_space<vmem>>, vector<16x8xf32>,
    %c0_i32_8 = arith.constant 0 : i32
    %c2_i32_9 = arith.constant 2 : i32
    %6 = arith.addi %c0_i32_8, %c2_i32_9 : i32
    %c1_i32_10 = arith.constant 1 : i32
    scf.for %arg10 = %c0_i32_8 to %6 step %c1_i32_10  : i32 {
      %c16_i32 = arith.constant 16 : i32
      %14 = arith.muli %arg10, %c16_i32 : i32
      %15 = tpu.assume_multiple %14, 16 : i32
      %16 = arith.index_cast %15 : i32 to index
      %c0_26 = arith.constant 0 : index
      %17 = vector.load %arg4[%16, %c0_26] : memref<32x16xf32, #tpu.memory_space<vmem>>, vector<16x16xf32>
      %cst_27 = arith.constant dense<0.000000e+00> : vector<8x16xf32>
      %18 = tpu.matmul %0, %17, %cst_27 {dimension_numbers = #tpu.dot_dimension_numbers<[1], [0], [0], [1], [0, 0, 1, 1], [], []>} : vector<8x16xf32>, vector<16x16xf32>, vector<8x16xf32> -> vector<8x16xf32>
      %c8_i32 = arith.constant 8 : i32
      %19 = arith.muli %arg10, %c8_i32 : i32
      %20 = tpu.assume_multiple %19, 8 : i32
      %21 = arith.index_cast %20 : i32 to index
      %c0_28 = arith.constant 0 : index
      %22 = vector.load %arg9[%21, %c0_28] : memref<16x16xf32, #tpu.memory_space<vmem>>, vector<8x16xf32>
      tpu.vector_store %arg9[%21, %c0_28], %18 {strides = array<i32>} : memref<16x16xf32, #tpu.memory_space<vmem>>, vector<8x16xf32>,
    }
    %c2_i32_11 = arith.constant 2 : i32
    %c0_12 = arith.constant 0 : index
    %c0_13 = arith.constant 0 : index
    %7 = vector.load %arg9[%c0_12, %c0_13] : memref<16x16xf32, #tpu.memory_space<vmem>>, vector<16x16xf32>
    %cst_14 = arith.constant dense<0.000000e+00> : vector<16x8xf32>
    %8 = tpu.matmul %7, %1, %cst_14 {dimension_numbers = #tpu.dot_dimension_numbers<[1], [0], [0], [1], [0, 0, 1, 1], [], []>} : vector<16x16xf32>, vector<16x8xf32>, vector<16x8xf32> -> vector<16x8xf32>
    %c0_15 = arith.constant 0 : index
    %c0_16 = arith.constant 0 : index
    %9 = vector.load %arg7[%c0_15, %c0_16] : memref<16x8xf32, #tpu.memory_space<vmem>>, vector<16x8xf32>
    tpu.vector_store %arg7[%c0_15, %c0_16], %8 {strides = array<i32>} : memref<16x8xf32, #tpu.memory_space<vmem>>, vector<16x8xf32>,
    %c0_i32_17 = arith.constant 0 : i32
    %c2_i32_18 = arith.constant 2 : i32
    %10 = arith.addi %c0_i32_17, %c2_i32_18 : i32
    %c1_i32_19 = arith.constant 1 : i32
    scf.for %arg10 = %c0_i32_17 to %10 step %c1_i32_19  : i32 {
      %c16_i32 = arith.constant 16 : i32
      %14 = arith.muli %arg10, %c16_i32 : i32
      %15 = tpu.assume_multiple %14, 16 : i32
      %16 = arith.index_cast %15 : i32 to index
      %c0_26 = arith.constant 0 : index
      %17 = vector.load %arg5[%16, %c0_26] : memref<32x16xf32, #tpu.memory_space<vmem>>, vector<16x16xf32>
      %cst_27 = arith.constant dense<0.000000e+00> : vector<8x16xf32>
      %18 = tpu.matmul %0, %17, %cst_27 {dimension_numbers = #tpu.dot_dimension_numbers<[1], [0], [0], [1], [0, 0, 1, 1], [], []>} : vector<8x16xf32>, vector<16x16xf32>, vector<8x16xf32> -> vector<8x16xf32>
      %c8_i32 = arith.constant 8 : i32
      %19 = arith.muli %arg10, %c8_i32 : i32
      %20 = tpu.assume_multiple %19, 8 : i32
      %21 = arith.index_cast %20 : i32 to index
      %c0_28 = arith.constant 0 : index
      %22 = vector.load %arg9[%21, %c0_28] : memref<16x16xf32, #tpu.memory_space<vmem>>, vector<8x16xf32>
      tpu.vector_store %arg9[%21, %c0_28], %18 {strides = array<i32>} : memref<16x16xf32, #tpu.memory_space<vmem>>, vector<8x16xf32>,
    }
    %c2_i32_20 = arith.constant 2 : i32
    %c0_21 = arith.constant 0 : index
    %c0_22 = arith.constant 0 : index
    %11 = vector.load %arg9[%c0_21, %c0_22] : memref<16x16xf32, #tpu.memory_space<vmem>>, vector<16x16xf32>
    %cst_23 = arith.constant dense<0.000000e+00> : vector<16x8xf32>
    %12 = tpu.matmul %11, %1, %cst_23 {dimension_numbers = #tpu.dot_dimension_numbers<[1], [0], [0], [1], [0, 0, 1, 1], [], []>} : vector<16x16xf32>, vector<16x8xf32>, vector<16x8xf32> -> vector<16x8xf32>
    %c0_24 = arith.constant 0 : index
    %c0_25 = arith.constant 0 : index
    %13 = vector.load %arg8[%c0_24, %c0_25] : memref<16x8xf32, #tpu.memory_space<vmem>>, vector<16x8xf32>
    tpu.vector_store %arg8[%c0_24, %c0_25], %12 {strides = array<i32>} : memref<16x8xf32, #tpu.memory_space<vmem>>, vector<16x8xf32>,
    return
  }
  func.func @transform_0(%arg0: i32) -> (i32, i32) {
    %c0_i32 = arith.constant 0 : i32
    %c0_i32_0 = arith.constant 0 : i32
    %c0_i32_1 = arith.constant 0 : i32
    return %c0_i32, %c0_i32_0 : i32, i32
  }
  func.func @transform_1(%arg0: i32) -> (i32, i32) {
    %c0_i32 = arith.constant 0 : i32
    %c0_i32_0 = arith.constant 0 : i32
    %c0_i32_1 = arith.constant 0 : i32
    return %c0_i32, %c0_i32_0 : i32, i32
  }
  func.func @transform_2(%arg0: i32) -> (i32, i32) {
    %c0_i32 = arith.constant 0 : i32
    %c0_i32_0 = arith.constant 0 : i32
    return %arg0, %c0_i32 : i32, i32
  }
  func.func @transform_3(%arg0: i32) -> (i32, i32) {
    %c0_i32 = arith.constant 0 : i32
    %c0_i32_0 = arith.constant 0 : i32
    return %arg0, %c0_i32 : i32, i32
  }
  func.func @transform_4(%arg0: i32) -> (i32, i32) {
    %c0_i32 = arith.constant 0 : i32
    %c0_i32_0 = arith.constant 0 : i32
    return %arg0, %c0_i32 : i32, i32
  }
  func.func @transform_5(%arg0: i32) -> (i32, i32) {
    %c0_i32 = arith.constant 0 : i32
    %c0_i32_0 = arith.constant 0 : i32
    return %arg0, %c0_i32 : i32, i32
  }
  func.func @transform_6(%arg0: i32) -> (i32, i32) {
    %c0_i32 = arith.constant 0 : i32
    %c0_i32_0 = arith.constant 0 : i32
    return %arg0, %c0_i32 : i32, i32
  }
  func.func @transform_7(%arg0: i32) -> (i32, i32) {
    %c0_i32 = arith.constant 0 : i32
    %c0_i32_0 = arith.constant 0 : i32
    return %arg0, %c0_i32 : i32, i32
  }
}

</mosaic_0001>

<bundles_post_ra>
// kernel: _resize_three_fused.1
= control target key start
LH: loop header
LB: loop body
LE: loop exit
PB: predicated region body
PF: predicated region fallthrough
CT: control target
= control target key end

     0   :  { %s2122_s0 = inlined_call_operand.vmem [shape: f32[8,16], index: 0, kind: input, shape index: {}]   ;;  %s2123_s1 = inlined_call_operand.vmem [shape: f32[16,8], index: 1, kind: input, shape index: {}]   ;;  %s2124_s2 = inlined_call_operand.hbm [shape: f32[128,16], index: 2, kind: input, shape index: {}]   ;;  %s2125_s3 = inlined_call_operand.hbm [shape: f32[128,16], index: 3, kind: input, shape index: {}]   ;;  %s2126_s4 = inlined_call_operand.hbm [shape: f32[128,16], index: 4, kind: input, shape index: {}]   ;;  %s2127_s5 = inlined_call_operand.hbm [shape: f32[64,8], index: 5, kind: output, shape index: {0}]   ;;  %s2128_s6 = inlined_call_operand.hbm [shape: f32[64,8], index: 6, kind: output, shape index: {1}]   ;;  %s2129_s7 = inlined_call_operand.hbm [shape: f32[64,8], index: 7, kind: output, shape index: {2}]  }
   0x1   :  { %2141 = sst [smem:[#allocation20_spill]] %s2124_s2 }
   0x2   :  { %2142 = sst [smem:[#allocation21_spill]] %s2125_s3 }
   0x3   :  { %13 = vsyncpa [#allocation4], 0 }
   0x4   :  { %15 = vsyncpa [#allocation4 + $0x1], 0 }
   0x5   :  { %16 = vsyncpa [#allocation7], 0 }
   0x6   :  { %18 = vsyncpa [#allocation7 + $0x1], 0 }
   0x7   :  { %19 = vsyncpa [#allocation5], 0 }
   0x8   :  { %21 = vsyncpa [#allocation5 + $0x1], 0 }
   0x9   :  { %22 = vsyncpa [#allocation11], 0 }
   0xa   :  { %24 = vsyncpa [#allocation11 + $0x1], 0  ;;  %s1720_s24 = smov 0   ;;  %s1722_s25 = smov 0  }
   0xb   :  { %s1724_s26 = smov 0   ;;  %s1726_s27 = smov 0  }
   0xc LB: > { %s1741_s28 = sadd.s32 4294967295, %s1647_s27   ;;  %s2130_s29 = sadd.s32 4294967294, %s1647_s27   ;;  %s1647_s27 = sphi %s1726_s27, %s2164_s27   ;;  %s1643_s26 = sphi %s1724_s26, %s2168_s26   ;;  %s1639_s25 = sphi %s1722_s25, %s2167_s25   ;;  %s1635_s24 = sphi %s1720_s24, %s2166_s24  }
   0xd   : > { %s1745_s30 = sadd.s32 1, %s1647_s27   ;;  %s79_s8 = sadd.s32 1, %s1643_s26 }
   0xe   : > { %2143 = sst [smem:[#allocation17_spill]] %s1745_s30  ;;  %s76_s9 = ssub.s32 %s1647_s27, %s1745_s30 }
   0xf   : > { %p86_p0 = scmp.ne.s32.totalorder %s1643_s26, %s1639_s25  ;;  %p77_p1 = scmp.eq.s32.totalorder %s76_s9, 0 }
  0x10   : > { %p87_p2 = scmp.eq.s32.totalorder %s1647_s27, 0  ;;  %p92_p3 = scmp.ne.s32.totalorder %s1639_s25, %s1635_s24 }
  0x11   : > { %p93_p4 = scmp.eq.s32.totalorder %s1741_s28, 0  ;;  %p168_p7 = scmp.eq.s32.totalorder %s1741_s28, 3 }
  0x12   : > { %s1757_s10 = scalar_select %p77_p1, %s1643_s26, %s79_s8  }
  0x13   : > { %p88_p5 = por %p87_p2, %p86_p0  ;;  %p1759_p6 = por %p93_p4, %p92_p3 }
  0x14   : > { %2144 = sst [smem:[#allocation18_spill]] %s1757_s10  ;;  %p174_p8 = scmp.eq.s32.totalorder %s2130_s29, 3 }
  0x15   : > { %s2145_s11 = scalar_select %p1759_p6, 1, 0 }
  0x16   : > { %p1344_p9 = scmp.lt.s32.totalorder %s1647_s27, 4  ;;  %p1767_p10 = por %p168_p7, %p86_p0 }
  0x17   : > { %p1771_p11 = por %p174_p8, %p92_p3  ;;  %s2131_s14 = sand.u32 1, %s1643_s26  }
  0x18   : > { %s2146_s12 = scalar_select %p1767_p10, 1, 0 }
  0x19   : > { %s2147_s13 = scalar_select %p1771_p11, 1, 0 }
  0x1a   : > { %s1777_s15 = sshll.u32 %s1647_s27, 9  ;;  %s1781_s16 = sshll.u32 %s2131_s14, 5 }
  0x1b   : > { %2148 = sst [smem:[#allocation19_spill]] %s2147_s13  ;;  %p1783_p12 = pnand %p1344_p9, %p88_p5 }
  0x1c   : > { %s273_s18 = sand.u32 1, %s1647_s27   ;;  %s2150_s3 = sld [smem:[#allocation21_spill]] }
  0x1d   : > { %s277_s22 = scalar_lea.vmem [#allocation6], %s1781_s16  ;;  %s1798_s8 = scalar_lea.sflag [#allocation7], %s273_s18 }
  0x1e   : > { %s284_s23 = sshll.u32 %s277_s22, 4  ;;  %p1804_p1 = pneg %p1783_p12  ;;  %s1795_s23 = int_to_ptr.vmem [resolvable:$true] %s284_s23 }
  0x22   : > { %s1792_s21 = scalar_lea.hbm %s2150_s3, %s1777_s15  ;;  %s1420_s22 = scalar_lea.hbm %s2150_s3, 2048 }
  0x23   : > { %s1415_s9 = scalar_lea.hbm %s1792_s21, 512  ;;  %p1421_p4 = scmp.lt.u32.totalorder %s1792_s21, %s2150_s3 }
  0x24   : > { %p1416_p0 = scmp.ne.s32.totalorder %s1792_s21, %s1415_s9  ;;  %p1422_p5 = scmp.lt.u32.totalorder %s1420_s22, %s1415_s9 }
  0x25   : > { %p1424_p8 = scmp.lt.u32.totalorder %s1415_s9, %s1792_s21 }
  0x26   : > { %p1418_p2 = pnand %p1804_p1, %p1416_p0  ;;  %p1423_p7 = por %p1422_p5, %p1421_p4 }
  0x28   : > { %p1419_p3 = pneg %p1418_p2  ;;  %p1425_p9 = por %p1424_p8, %p1423_p7 }
  0x2a   : > { %p1426_p13 = pnand %p1425_p9, %p1419_p3 }
  0x2c   : > { %1429 = shalt.err (!%p1426_p13)
}
  0x2d   : > { %s1430_s18 = scalar_lea.vmem %s1795_s23, 512  ;;  %s1661_s19 = smov [#allocation6]  }
  0x2e   : > { %p1431_p0 = scmp.ne.s32.totalorder %s1795_s23, %s1430_s18  ;;  %s1435_s20 = sshll.u32 %s1661_s19, 4  ;;  %s1436_s20 = int_to_ptr.vmem [resolvable:$false] %s1435_s20 }
  0x2f   : > { %s1437_s10 = scalar_lea.vmem %s1436_s20, 1024  ;;  %p1438_p10 = scmp.lt.s32.totalorder %s1795_s23, %s1436_s20 }
  0x30   : > { %p1433_p2 = pnand %p1431_p0, %p1804_p1  ;;  %p1439_p6 = scmp.lt.s32.totalorder %s1437_s10, %s1430_s18 }
  0x32   : > { %p1434_p11 = pneg %p1433_p2  ;;  %p1440_p4 = por %p1439_p6, %p1438_p10 }
  0x34   : > { %p1441_p5 = pnand %p1440_p4, %p1434_p11 }
  0x36   : > { %1444 = shalt.err (!%p1441_p5)
}
  0x37   : > { %s2134_s14 = smov 128   ;;  %s2136_s9 = smov 8  }
  0x38   : > { %1330 = dma.hbm_to_vmem [thread:$0]  (!%p1783_p12), %s1792_s21, 512, %s1795_s23, %s1798_s8, %s2134_s14, %s2134_s14, %s2136_s9  }
  0x39   : > { %p313_p6 = scmp.lt.s32.totalorder %s1647_s27, 5  ;;  %s2152_s2 = sld [smem:[#allocation20_spill]] }
  0x3a   : > { %p2153_p10 = scmp.ge.s32.totalorder %s1647_s27, 1  ;;  %s256_s10 = scalar_lea.vmem [#allocation3], %s1781_s16 }
  0x3b   : > { %s263_s3 = sshll.u32 %s256_s10, 4  ;;  %s2155_s21 = sand.u32 1, %s1643_s26   ;;  %s1845_s3 = int_to_ptr.vmem [resolvable:$true] %s263_s3 }
  0x3c   : > { %p1840_p11 = pnand %p2153_p10, %p313_p6  ;;  %s1849_s23 = scalar_lea.sflag [#allocation4], %s2155_s21 }
  0x3e   : > { %s2154_s20 = scalar_select %p1840_p11, 1, 0 }
  0x3f   : > { %s1836_s19 = scalar_lea.hbm %s2152_s2, %s1777_s15  ;;  %s1450_s9 = scalar_lea.hbm %s2152_s2, 2048 }
  0x40   : > { %s1445_s14 = scalar_lea.hbm %s1836_s19, 512  ;;  %p1451_p8 = scmp.lt.u32.totalorder %s1836_s19, %s2152_s2 }
  0x41   : > { %p1446_p13 = scmp.ne.s32.totalorder %s1836_s19, %s1445_s14  ;;  %p1452_p9 = scmp.lt.u32.totalorder %s1450_s9, %s1445_s14 }
  0x42   : > { %p1454_p2 = scmp.lt.u32.totalorder %s1445_s14, %s1836_s19 }
  0x43   : > { %p1448_p3 = pnand %p1446_p13, %p1804_p1  ;;  %p1453_p0 = por %p1452_p9, %p1451_p8 }
  0x45   : > { %p1449_p7 = pneg %p1448_p3  ;;  %p1455_p4 = por %p1454_p2, %p1453_p0 }
  0x47   : > { %p1456_p5 = pnand %p1455_p4, %p1449_p7 }
  0x49   : > { %1459 = shalt.err (!%p1456_p5)
}
  0x4a   : > { %s1460_s10 = scalar_lea.vmem %s1845_s3, 512  ;;  %s1664_s21 = smov [#allocation3]  }
  0x4b   : > { %p1461_p6 = scmp.ne.s32.totalorder %s1845_s3, %s1460_s10  ;;  %s1465_s22 = sshll.u32 %s1664_s21, 4  ;;  %s1466_s22 = int_to_ptr.vmem [resolvable:$false] %s1465_s22 }
  0x4c   : > { %s1467_s30 = scalar_lea.vmem %s1466_s22, 1024  ;;  %p1468_p3 = scmp.lt.s32.totalorder %s1845_s3, %s1466_s22 }
  0x4d   : > { %p1463_p10 = pnand %p1461_p6, %p1804_p1  ;;  %p1469_p11 = scmp.lt.s32.totalorder %s1467_s30, %s1460_s10 }
  0x4f   : > { %p1464_p13 = pneg %p1463_p10  ;;  %p1470_p8 = por %p1469_p11, %p1468_p3 }
  0x51   : > { %p1471_p9 = pnand %p1470_p8, %p1464_p13 }
  0x53   : > { %1474 = shalt.err (!%p1471_p9)
}
  0x54   : > { %s2156_s13 = smov 8   ;;  %s2157_s14 = smov 128  }
  0x55   : > { %1327 = dma.hbm_to_vmem [thread:$0]  (!%p1783_p12), %s1836_s19, 512, %s1845_s3, %s1849_s23, %s2157_s14, %s2157_s14, %s2156_s13  }
  0x56   : > { %s1880_s21 = scalar_lea.hbm %s2126_s4, %s1777_s15  ;;  %s298_s10 = scalar_lea.vmem [#allocation8], %s1781_s16 }
  0x57   : > { %s305_s22 = sshll.u32 %s298_s10, 4  ;;  %s1475_s30 = scalar_lea.hbm %s1880_s21, 512  ;;  %s1883_s22 = int_to_ptr.vmem [resolvable:$true] %s305_s22 }
  0x58   : > { %p1476_p11 = scmp.ne.s32.totalorder %s1880_s21, %s1475_s30  ;;  %s1480_s19 = scalar_lea.hbm %s2126_s4, 2048 }
  0x59   : > { %p1481_p2 = scmp.lt.u32.totalorder %s1880_s21, %s2126_s4  ;;  %p1482_p4 = scmp.lt.u32.totalorder %s1480_s19, %s1475_s30 }
  0x5a   : > { %p1478_p7 = pnand %p1476_p11, %p1804_p1  ;;  %p1484_p6 = scmp.lt.u32.totalorder %s1475_s30, %s1880_s21 }
  0x5b   : > { %p1483_p5 = por %p1482_p4, %p1481_p2 }
  0x5c   : > { %p1479_p0 = pneg %p1478_p7 }
  0x5d   : > { %p1485_p10 = por %p1484_p6, %p1483_p5 }
  0x5f   : > { %p1486_p13 = pnand %p1485_p10, %p1479_p0 }
  0x61   : > { %1489 = shalt.err (!%p1486_p13)
}
  0x62   : > { %s1490_s16 = scalar_lea.vmem %s1883_s22, 512  ;;  %s1665_s2 = smov [#allocation8]  }
  0x63   : > { %p1491_p3 = scmp.ne.s32.totalorder %s1883_s22, %s1490_s16  ;;  %s1495_s9 = sshll.u32 %s1665_s2, 4  ;;  %s1496_s9 = int_to_ptr.vmem [resolvable:$false] %s1495_s9 }
  0x64   : > { %s1497_s18 = scalar_lea.vmem %s1496_s9, 1024  ;;  %p1498_p11 = scmp.lt.s32.totalorder %s1883_s22, %s1496_s9 }
  0x65   : > { %p1493_p8 = pnand %p1491_p3, %p1804_p1  ;;  %p1499_p7 = scmp.lt.s32.totalorder %s1497_s18, %s1490_s16 }
  0x67   : > { %p1494_p9 = pneg %p1493_p8  ;;  %p1500_p2 = por %p1499_p7, %p1498_p11 }
  0x69   : > { %p1501_p4 = pnand %p1500_p2, %p1494_p9 }
  0x6b   : > { %1504 = shalt.err (!%p1501_p4)
}
  0x6c   : > { %1333 = dma.hbm_to_vmem [thread:$0]  (!%p1783_p12), %s1880_s21, 512, %s1883_s22, %s1798_s8, %s2157_s14, %s2157_s14, %s2156_s13  }
  0x6d   : > { %p2158_p1 = scmp.ne.s32.totalorder %s2154_s20, 0 }
  0x6e   : > { %s1913_s29 = sand.u32 (!%p2158_p1), 1, %s1639_s25   ;;  %p2159_p0 = scmp.ne.s32.totalorder (!%p2158_p1), %s2145_s11, 0 }
  0x6f   : > { %317 = sbr.rel (%p2158_p1) target bundleno = 1467 (0x5bb), region = 40  ;;  %s1916_s10 = sshll.u32 (!%p2158_p1), %s1913_s29, 5 }
  0x70   : > { %s320_s17 = scalar_lea.sflag (!%p2158_p1), [#allocation4], %s1913_s29  ;;  %s323_s30 = scalar_lea.vmem (!%p2158_p1), [#allocation3], %s1916_s10 }
  0x76   : > { %1618 = dma.done.wait (%p2159_p0), %s320_s17, 512  }
  0x77   : > { %1620 = vsyncadd (%p2159_p0), %s320_s17, 4294966784  ;;  %s328_s8 = sand.u32 1, %s1741_s28   ;;  %s332_s13 = scalar_lea.vmem [#allocation6], %s1916_s10 }
  0x78   : > { %s329_s20 = scalar_lea.sflag [#allocation7], %s328_s8 }
  0x79   : > { %1622 = dma.done.wait (%p2159_p0), %s329_s20, 1024  }
  0x7a   : > { %1624 = vsyncadd (%p2159_p0), %s329_s20, 4294966272  ;;  %s1193_s14 = sshll.u32 %s1913_s29, 4  ;;  %v1936_v0 = vld [vmem:[%s2122_s0] sm:$0xff]  ;;  %v400_v2 = vld [vmem:[%s2123_s1 + $0x8] sm:$0xff]  ;;  %s341_s16 = scalar_lea.vmem [#allocation8], %s1916_s10 }
  0x7b   : > { %v399_v1 = vld [vmem:[%s2123_s1] sm:$0xff]  ;;  %s1945_s2 = scalar_lea.vmem [#allocation9], %s1193_s14  ;;  %s1947_s11 = scalar_lea.vmem [#allocation10], %s1193_s14 }
  0x7c   : > { %s1949_s9 = scalar_lea.vmem [#allocation12], %s1193_s14  ;;  %s1649_s18 = smov 0  }
  0x7d LB: >> { %v1666_v3 = vmov 0.0|0.0   ;;  %vm1667_vm0 = vmmov 0   ;;  %v1668_v4 = vmov 0.0   ;;  %s1196_s17 = sshll.u32 %s1651_s18, 4  ;;  %vm411_vm1 = vcmask 130048   ;;  %s1198_s14 = sshll.u32 %s1651_s18, 3  ;;  %s1651_s18 = sphi %s1649_s18, %s406_s18  }
  0x7e   : >> { %1291 = vmatprep.subr.bf16.mxu0 %v1666_v3  ;;  %1253 = vmatprep.mubr.msk.f32.mxu0 %vm1667_vm0, %v1668_v4  ;;  %s408_s20 = scalar_lea.vmem %s323_s30, %s1196_s17 [#allocation3]  ;;  %s486_s21 = scalar_lea.vmem [#allocation2], %s1198_s14 }
  0x7f   : >> { %v409_v5 = vld [vmem:[%s408_s20] sm:$0xff]  ;;  %v410_v6 = vld [vmem:[%s408_s20 + $0x8] sm:$0xff]  ;;  %s406_s18 = sadd.s32 1, %s1651_s18  }
  0x80   : >> { %v1292_v7 = vpack.c.bf16 %v410_v6, %v409_v5  ;;  %p403_p12 = scmp.ge.s32.totalorder %s406_s18, 2  }
  0x81   : > { %v1956_v10 = vpack.c.bf16 (%p403_p12), %v400_v2, %v399_v1  ;;  %vm572_vm2 = vcmask (%p403_p12), 64512   ;;  %s1653_s30 = smov (%p403_p12), 0  }
  0x82   : >> { %1293 = vmatpush3.bf16.msra.mxu0 %v1292_v7 }
  0x83   : > { %1295 = vmatprep.subr.bf16.mxu0 (%p403_p12), %v1956_v10 }
  0x85   : >> { %1254 = vmatmul.mubr.msk.f32.vlgmr.msra.gmra.mrb[0].mxu0 %vm411_vm1, %v1936_v0 }
  0x86   : > { %1297 = vmatpush3.bf16.msra.mxu0 (%p403_p12), %v1956_v10 }
 0x153   : > { %405 = sbr.rel (!%p403_p12) target bundleno = 125 (0x7d), region = 168 }
 0x158   : >> { %v481_v8 = vpop.f32.mrb[0].mxu0 }
 0x159   : >> { %487 = vst.msk [vmem:[%s486_s21] sm:$0xff] %vm411_vm1, %v481_v8  ;;  %v1255_v9 = vpop.f32.mrb[1].mxu0 }
 0x160   : > { %v488_v11 = vld [vmem:[#allocation2] sm:$0xff]  ;;  %v489_v12 = vld [vmem:[#allocation2 + $0x8] sm:$0xff] }
 0x161   : > { %1260 = vmatprep.mubr.msk.f32.mxu0 %vm411_vm1, %v488_v11 }
 0x162   : > { %1261 = vmatmul.mubr.msk.f32.vlgmr.msra.gmra.mrb[0].mxu0 %vm411_vm1, %v489_v12 }
 0x235   : > { %v1262_v13 = vpop.f32.mrb[0].mxu0 }
 0x236   : > { %574 = vst.msk [vmem:[%s1945_s2 + $0x8] sm:$0xff] %vm572_vm2, %v1262_v13  ;;  %v563_v14 = vpop.f32.mrb[1].mxu0 }
 0x237   : > { %573 = vst.msk [vmem:[%s1945_s2] sm:$0xff] %vm572_vm2, %v563_v14 }
 0x238 LB: >> { %v1669_v15 = vmov 0.0|0.0   ;;  %vm1670_vm3 = vmmov 0   ;;  %v1671_v16 = vmov 0.0   ;;  %s1201_s22 = sshll.u32 %s1655_s30, 4  ;;  %s1203_s19 = sshll.u32 %s1655_s30, 3  ;;  %s1655_s30 = sphi %s1653_s30, %s580_s30  }
 0x239   : >> { %1298 = vmatprep.subr.bf16.mxu0 %v1669_v15  ;;  %1267 = vmatprep.mubr.msk.f32.mxu0 %vm1670_vm3, %v1671_v16  ;;  %s582_s3 = scalar_lea.vmem %s332_s13, %s1201_s22 [#allocation6]  ;;  %s659_s23 = scalar_lea.vmem [#allocation2], %s1203_s19 }
 0x23a   : >> { %v583_v17 = vld [vmem:[%s582_s3] sm:$0xff]  ;;  %v584_v18 = vld [vmem:[%s582_s3 + $0x8] sm:$0xff]  ;;  %s580_s30 = sadd.s32 1, %s1655_s30  }
 0x23b   : >> { %v1299_v19 = vpack.c.bf16 %v584_v18, %v583_v17  ;;  %p577_p5 = scmp.ge.s32.totalorder %s580_s30, 2  }
 0x23c   : > { %s1657_s15 = smov (%p577_p5), 0  }
 0x23d   : >> { %1300 = vmatpush3.bf16.msra.mxu0 %v1299_v19 }
 0x23e   : > { %1302 = vmatprep.subr.bf16.mxu0 (%p577_p5), %v1956_v10 }
 0x240   : >> { %1268 = vmatmul.mubr.msk.f32.vlgmr.msra.gmra.mrb[0].mxu0 %vm411_vm1, %v1936_v0 }
 0x241   : > { %1304 = vmatpush3.bf16.msra.mxu0 (%p577_p5), %v1956_v10 }
 0x30e   : > { %579 = sbr.rel (!%p577_p5) target bundleno = 568 (0x238), region = 179 }
 0x313   : >> { %v654_v20 = vpop.f32.mrb[0].mxu0 }
 0x314   : >> { %660 = vst.msk [vmem:[%s659_s23] sm:$0xff] %vm411_vm1, %v654_v20  ;;  %v1269_v21 = vpop.f32.mrb[1].mxu0 }
 0x31b   : > { %v661_v22 = vld [vmem:[#allocation2] sm:$0xff]  ;;  %v662_v23 = vld [vmem:[#allocation2 + $0x8] sm:$0xff] }
 0x31c   : > { %1274 = vmatprep.mubr.msk.f32.mxu0 %vm411_vm1, %v661_v22 }
 0x31d   : > { %1275 = vmatmul.mubr.msk.f32.vlgmr.msra.gmra.mrb[0].mxu0 %vm411_vm1, %v662_v23 }
 0x3f0   : > { %v1276_v24 = vpop.f32.mrb[0].mxu0 }
 0x3f1   : > { %745 = vst.msk [vmem:[%s1947_s11 + $0x8] sm:$0xff] %vm572_vm2, %v1276_v24  ;;  %v735_v25 = vpop.f32.mrb[1].mxu0 }
 0x3f2   : > { %744 = vst.msk [vmem:[%s1947_s11] sm:$0xff] %vm572_vm2, %v735_v25 }
 0x3f3 LB: >> { %v1672_v26 = vmov 0.0|0.0   ;;  %vm1673_vm4 = vmmov 0   ;;  %v1674_v27 = vmov 0.0   ;;  %s1206_s13 = sshll.u32 %s1659_s15, 4  ;;  %s1208_s17 = sshll.u32 %s1659_s15, 3  ;;  %s1659_s15 = sphi %s1657_s15, %s751_s15  }
 0x3f4   : >> { %1305 = vmatprep.subr.bf16.mxu0 %v1672_v26  ;;  %1281 = vmatprep.mubr.msk.f32.mxu0 %vm1673_vm4, %v1674_v27  ;;  %s753_s18 = scalar_lea.vmem %s341_s16, %s1206_s13 [#allocation8]  ;;  %s830_s20 = scalar_lea.vmem [#allocation2], %s1208_s17 }
 0x3f5   : >> { %v754_v28 = vld [vmem:[%s753_s18] sm:$0xff]  ;;  %v755_v29 = vld [vmem:[%s753_s18 + $0x8] sm:$0xff]  ;;  %s751_s15 = sadd.s32 1, %s1659_s15  }
 0x3f6   : >> { %v1306_v30 = vpack.c.bf16 %v755_v29, %v754_v28  ;;  %p748_p6 = scmp.ge.s32.totalorder %s751_s15, 2  }
 0x3f7   : > { %s1989_s14 = sshll.u32 (%p748_p6), %s1741_s28, 8  ;;  %s957_s21 = sshll.u32 (%p748_p6), %s1947_s11, 4  ;;  %s1998_s21 = int_to_ptr.vmem [resolvable:$true] %s957_s21 }
 0x3f8   : >> { %1307 = vmatpush3.bf16.msra.mxu0 %v1306_v30  ;;  %s1996_s10 = scalar_lea.hbm (%p748_p6), %s2128_s6, %s1989_s14  ;;  %s2002_s16 = scalar_lea.sflag (%p748_p6), [#allocation11], %s328_s8 }
 0x3f9   : > { %1309 = vmatprep.subr.bf16.mxu0 (%p748_p6), %v1956_v10  ;;  %s1505_s3 = scalar_lea.vmem (%p748_p6), %s1998_s21, 256  ;;  %p2160_p13 = scmp.ne.s32.totalorder (%p748_p6), %s2146_s12, 0 }
 0x3fa   : > { %p1506_p10 = scmp.ne.s32.totalorder (%p748_p6), %s1998_s21, %s1505_s3  ;;  %s1675_s19 = smov (%p748_p6), [#allocation10]  }
 0x3fb   : >> { %1282 = vmatmul.mubr.msk.f32.vlgmr.msra.gmra.mrb[0].mxu0 %vm411_vm1, %v1936_v0  ;;  %s1509_s11 = sshll.u32 (%p748_p6), %s1675_s19, 4  ;;  %s1510_s11 = int_to_ptr.vmem [resolvable:$false] %s1509_s11 }
 0x3fc   : > { %1311 = vmatpush3.bf16.msra.mxu0 (%p748_p6), %v1956_v10  ;;  %p1507_p3 = pnand (%p748_p6), %p1506_p10, %p2160_p13  ;;  %s1511_s23 = scalar_lea.vmem (%p748_p6), %s1510_s11, 512 }
 0x3fd   : > { %p1512_p9 = scmp.lt.s32.totalorder (%p748_p6), %s1998_s21, %s1510_s11  ;;  %p1513_p11 = scmp.lt.s32.totalorder (%p748_p6), %s1511_s23, %s1505_s3 }
 0x3fe   : > { %p1508_p8 = pneg (%p748_p6), %p1507_p3 }
 0x3ff   : > { %p1514_p7 = por (%p748_p6), %p1513_p11, %p1512_p9 }
 0x401   : > { %p1515_p2 = pnand (%p748_p6), %p1514_p7, %p1508_p8 }
 0x4c9   : > { %750 = sbr.rel (!%p748_p6) target bundleno = 1011 (0x3f3), region = 190 }
 0x4ce   : >> { %v825_v31 = vpop.f32.mrb[0].mxu0 }
 0x4cf   : >> { %831 = vst.msk [vmem:[%s830_s20] sm:$0xff] %vm411_vm1, %v825_v31  ;;  %v1283_v32 = vpop.f32.mrb[1].mxu0 }
 0x4d6   : > { %v832_v33 = vld [vmem:[#allocation2] sm:$0xff]  ;;  %v833_v34 = vld [vmem:[#allocation2 + $0x8] sm:$0xff] }
 0x4d7   : > { %1288 = vmatprep.mubr.msk.f32.mxu0 %vm411_vm1, %v832_v33 }
 0x4d8   : > { %1289 = vmatmul.mubr.msk.f32.vlgmr.msra.gmra.mrb[0].mxu0 %vm411_vm1, %v833_v34 }
 0x4d9   : > { %1518 = shalt.err (!%p1515_p2)
}
 0x4da   : > { %s1519_s28 = scalar_lea.hbm %s1996_s10, 256  ;;  %s1523_s13 = scalar_lea.hbm %s2128_s6, 1024 }
 0x4db   : > { %p1520_p4 = scmp.ne.s32.totalorder %s1996_s10, %s1519_s28  ;;  %p1524_p12 = scmp.lt.u32.totalorder %s1996_s10, %s2128_s6 }
 0x4dc   : > { %p1525_p5 = scmp.lt.u32.totalorder %s1523_s13, %s1519_s28  ;;  %p1527_p10 = scmp.lt.u32.totalorder %s1519_s28, %s1996_s10 }
 0x4dd   : > { %p1521_p1 = pnand %p1520_p4, %p2160_p13 }
 0x4de   : > { %p1526_p6 = por %p1525_p5, %p1524_p12 }
 0x4df   : > { %p1522_p0 = pneg %p1521_p1 }
 0x4e0   : > { %p1528_p3 = por %p1527_p10, %p1526_p6 }
 0x4e2   : > { %p1529_p8 = pnand %p1528_p3, %p1522_p0 }
 0x4e4   : > { %1532 = shalt.err (!%p1529_p8)
}
 0x4e5   : > { %s1676_s20 = smov 128   ;;  %s1677_s30 = smov 8  }
 0x4e6   : > { %1319 = dma.vmem_to_hbm [thread:$0]  (%p2160_p13), %s1998_s21, 256, %s1996_s10, %s2002_s16, %s1676_s20, %s1676_s20, %s1677_s30  }
 0x4e7   : > { %s2033_s19 = scalar_lea.hbm %s2127_s5, %s1989_s14  ;;  %s941_s11 = sshll.u32 %s1945_s2, 4  ;;  %s2036_s11 = int_to_ptr.vmem [resolvable:$true] %s941_s11 }
 0x4e8   : > { %s918_s23 = scalar_lea.sflag [#allocation5], %s1913_s29  ;;  %s1533_s28 = scalar_lea.vmem %s2036_s11, 256 }
 0x4e9   : > { %p1534_p9 = scmp.ne.s32.totalorder %s2036_s11, %s1533_s28  ;;  %s1678_s8 = smov [#allocation9]  }
 0x4ea   : > { %s1537_s15 = sshll.u32 %s1678_s8, 4  ;;  %s1538_s15 = int_to_ptr.vmem [resolvable:$false] %s1537_s15 }
 0x4eb   : > { %p1535_p11 = pnand %p1534_p9, %p2160_p13  ;;  %s1539_s21 = scalar_lea.vmem %s1538_s15, 512 }
 0x4ec   : > { %p1540_p2 = scmp.lt.s32.totalorder %s2036_s11, %s1538_s15  ;;  %p1541_p4 = scmp.lt.s32.totalorder %s1539_s21, %s1533_s28 }
 0x4ed   : > { %p1536_p7 = pneg %p1535_p11 }
 0x4ee   : > { %p1542_p1 = por %p1541_p4, %p1540_p2 }
 0x4f0   : > { %p1543_p0 = pnand %p1542_p1, %p1536_p7 }
 0x4f2   : > { %1546 = shalt.err (!%p1543_p0)
}
 0x4f3   : > { %s1547_s2 = scalar_lea.hbm %s2033_s19, 256  ;;  %s1551_s18 = scalar_lea.hbm %s2127_s5, 1024 }
 0x4f4   : > { %p1548_p12 = scmp.ne.s32.totalorder %s2033_s19, %s1547_s2  ;;  %p1552_p10 = scmp.lt.u32.totalorder %s2033_s19, %s2127_s5 }
 0x4f5   : > { %p1553_p3 = scmp.lt.u32.totalorder %s1551_s18, %s1547_s2  ;;  %p1555_p9 = scmp.lt.u32.totalorder %s1547_s2, %s2033_s19 }
 0x4f6   : > { %p1549_p5 = pnand %p1548_p12, %p2160_p13 }
 0x4f7   : > { %p1554_p8 = por %p1553_p3, %p1552_p10 }
 0x4f8   : > { %p1550_p6 = pneg %p1549_p5 }
 0x4f9   : > { %p1556_p11 = por %p1555_p9, %p1554_p8 }
 0x4fb   : > { %p1557_p7 = pnand %p1556_p11, %p1550_p6 }
 0x4fd   : > { %1560 = shalt.err (!%p1557_p7)
}
 0x4fe   : > { %1318 = dma.vmem_to_hbm [thread:$0]  (%p2160_p13), %s2036_s11, 256, %s2033_s19, %s918_s23, %s1676_s20, %s1676_s20, %s1677_s30  }
 0x4ff   : > { %s973_s3 = sshll.u32 %s1949_s9, 4  ;;  %s2070_s15 = scalar_lea.hbm %s2129_s7, %s1989_s14  ;;  %s2072_s3 = int_to_ptr.vmem [resolvable:$true] %s973_s3 }
 0x500   : > { %s1561_s29 = scalar_lea.vmem %s2072_s3, 256  ;;  %s1679_s19 = smov [#allocation12]  }
 0x501   : > { %p1562_p2 = scmp.ne.s32.totalorder %s2072_s3, %s1561_s29  ;;  %s1565_s11 = sshll.u32 %s1679_s19, 4  ;;  %s1566_s11 = int_to_ptr.vmem [resolvable:$false] %s1565_s11 }
 0x502   : > { %s1567_s14 = scalar_lea.vmem %s1566_s11, 512  ;;  %p1568_p0 = scmp.lt.s32.totalorder %s2072_s3, %s1566_s11 }
 0x503   : > { %p1563_p4 = pnand %p1562_p2, %p2160_p13  ;;  %p1569_p12 = scmp.lt.s32.totalorder %s1567_s14, %s1561_s29 }
 0x505   : > { %p1564_p1 = pneg %p1563_p4  ;;  %p1570_p5 = por %p1569_p12, %p1568_p0 }
 0x507   : > { %p1571_p6 = pnand %p1570_p5, %p1564_p1 }
 0x5ab   : > { %v1290_v35 = vpop.f32.mrb[0].mxu0 }
 0x5ac   : > { %916 = vst.msk [vmem:[%s1949_s9 + $0x8] sm:$0xff] %vm572_vm2, %v1290_v35  ;;  %v906_v36 = vpop.f32.mrb[1].mxu0 }
 0x5ad   : > { %915 = vst.msk [vmem:[%s1949_s9] sm:$0xff] %vm572_vm2, %v906_v36 }
 0x5ae   : > { %1574 = shalt.err (!%p1571_p6)
}
 0x5af   : > { %s1575_s9 = scalar_lea.hbm %s2070_s15, 256  ;;  %s1579_s2 = scalar_lea.hbm %s2129_s7, 1024 }
 0x5b0   : > { %p1576_p10 = scmp.ne.s32.totalorder %s2070_s15, %s1575_s9  ;;  %p1580_p9 = scmp.lt.u32.totalorder %s2070_s15, %s2129_s7 }
 0x5b1   : > { %p1581_p11 = scmp.lt.u32.totalorder %s1579_s2, %s1575_s9  ;;  %p1583_p2 = scmp.lt.u32.totalorder %s1575_s9, %s2070_s15 }
 0x5b2   : > { %p1577_p3 = pnand %p1576_p10, %p2160_p13 }
 0x5b3   : > { %p1582_p7 = por %p1581_p11, %p1580_p9 }
 0x5b4   : > { %p1578_p8 = pneg %p1577_p3 }
 0x5b5   : > { %p1584_p4 = por %p1583_p2, %p1582_p7 }
 0x5b7   : > { %p1585_p1 = pnand %p1584_p4, %p1578_p8 }
 0x5b9   : > { %1588 = shalt.err (!%p1585_p1)
}
 0x5ba   : > { %1320 = dma.vmem_to_hbm [thread:$0]  (%p2160_p13), %s2072_s3, 256, %s2070_s15, %s2002_s16, %s1676_s20, %s1676_s20, %s1677_s30  }
 0x5bb PF: > { %s2161_s18 = sld [smem:[#allocation19_spill]]  ;;  %p1345_p0 = scmp.ge.s32.totalorder %s1647_s27, 2 }
 0x5bc   : > { %s988_s17 = sand.u32 1, %s1635_s24  }
 0x5bd   : > { %s989_s22 = scalar_lea.sflag [#allocation5], %s988_s17 }
 0x5c1   : > { %p2162_p12 = scmp.ne.s32.totalorder %s2161_s18, 0 }
 0x5c3   : > { %p1335_p5 = pnand %p1345_p0, %p2162_p12 }
 0x5c5   : > { %1626 = dma.done.wait (!%p1335_p5), %s989_s22, 256  }
 0x5c6   : > { %1628 = vsyncadd (!%p1335_p5), %s989_s22, 4294967040  ;;  %s2163_s12 = sadd.s32 4294967294, %s1647_s27  }
 0x5c7   : > { %s997_s28 = sand.u32 1, %s2163_s12  }
 0x5c8   : > { %s998_s8 = scalar_lea.sflag [#allocation11], %s997_s28 }
 0x5c9   : > { %1630 = dma.done.wait (!%p1335_p5), %s998_s8, 512  }
 0x5ca   : > { %1632 = vsyncadd (!%p1335_p5), %s998_s8, 4294966784  ;;  %s2164_s27 = sld [smem:[#allocation17_spill]]  ;;  %s2165_s16 = sld [smem:[#allocation18_spill]] }
 0x5cb   : > { %s2166_s24 = smov %s1639_s25  ;;  %s2167_s25 = smov %s1643_s26 }
 0x5d0   : > { %p27_p13 = scmp.ge.s32.totalorder %s2164_s27, 6   ;;  %s2168_s26 = smov %s2165_s16 }
 0x5d2   :  { %29 = sbr.rel (!%p27_p13) target bundleno = 12 (0xc), region = 201 }
 0x5d9   :  { %1012 = vsyncpa [#allocation4], 1 }
 0x5da   :  { %1014 = vsyncpa [#allocation4 + $0x1], 1 }
 0x5db   :  { %1015 = vsyncpa [#allocation7], 1 }
 0x5dc   :  { %1017 = vsyncpa [#allocation7 + $0x1], 1 }
 0x5dd   :  { %1018 = vsyncpa [#allocation5], 1 }
 0x5de   :  { %1020 = vsyncpa [#allocation5 + $0x1], 1 }
 0x5df   :  { %1021 = vsyncpa [#allocation11], 1 }
 0x5e0   :  { %1023 = vsyncpa [#allocation11 + $0x1], 1 }

</bundles_post_ra>
